<compile_context>
chip_gen: v7x
topology: tpu7x:2x2x1
jax: 0.10.0
libtpu: 0.0.40
codegen_flags: <defaults>
</compile_context>

<pallas_src>
import functools

import jax
import jax.numpy as jnp
import numpy as np
from jax import lax
from jax.experimental import pallas as pl
from jax.experimental.pallas import tpu as pltpu

_TASKS = ('tws', 'et', 'swe', 'q')
_NPLANES = 9          # [sum|d|, count] x 4 tasks + [cwd constraint row sums]
_LANE = 128
_SUBLANE = 8
_TARGET_BLOCK_BYTES = 3 << 19            # ~1.5 MiB per (bt, S_pad) f32 input block
_VMEM_LIMIT_BYTES = 48 * 1024 * 1024     # explicit: > v5e's 16 MiB default, < v7x's 64 MiB
_N_PAR = 2                               # leading "parallel" grid axis (v7x megacore)


# ----------------------------------------------------------------------------
# Tiling chooser: row block is a multiple of 8, block <= ~1.5 MiB, batch padded
# so the grid (n_par, n_inner) covers it exactly.
# ----------------------------------------------------------------------------
def _choose_tiling(B, S_pad):
    bt = max(_SUBLANE, (_TARGET_BLOCK_BYTES // (4 * S_pad)) // _SUBLANE * _SUBLANE)
    per_slice = -(-B // _N_PAR)                        # ceil(B / n_par)
    bt = min(bt, -(-per_slice // _SUBLANE) * _SUBLANE) # don't exceed what one slice needs
    n_inner = -(-per_slice // bt)
    B_pad = _N_PAR * n_inner * bt
    return bt, n_inner, B_pad


def _pad2d(x, B_pad, S_pad, value):
    B, S = x.shape
    if B_pad == B and S_pad == S:
        return x
    return jnp.pad(x, ((0, B_pad - B), (0, S_pad - S)), constant_values=value)


# ----------------------------------------------------------------------------
# Fused kernel factory (S_real, S_pad, k, clamp_max are Python scalars)
# ----------------------------------------------------------------------------
def _make_kernel(S_real, S_pad, k, clamp_max):

    def fold(x):
        """(bt, C) -> (8, C) by summing groups of 8 rows (pure VPU adds)."""
        r = x.shape[0] // _SUBLANE
        if r == 1:
            return x
        return jnp.sum(x.reshape(r, _SUBLANE, x.shape[1]), axis=0)

    def kernel(tws_p, tws_t, et_p, et_t, swe_p, swe_t, q_p, q_t, cwd_ref, out_ref):
        # out_ref block: (1, _NPLANES, 8, S_pad), resident across the inner (arbitrary)
        # grid axis -> acts as a lane-dense accumulator; init once per parallel slice.
        @pl.when(pl.program_id(1) == 0)
        def _init():
            out_ref[...] = jnp.zeros_like(out_ref)

        bt = cwd_ref.shape[0]

        if S_pad == S_real:
            lane_ok = None
            lane_okf = None
        else:
            lane_idx = lax.broadcasted_iota(jnp.int32, (bt, S_pad), 1)
            lane_ok = lane_idx < S_real
            lane_okf = lane_ok.astype(jnp.float32)

        def accum_task(plane, p_ref, t_ref, clamp=None, center=False):
            p = p_ref[...].astype(jnp.float32)
            t = t_ref[...].astype(jnp.float32)
            if clamp is not None:                       # swe saturation clamp
                p = jnp.minimum(p, clamp)
                t = jnp.minimum(t, clamp)
            # standardization folds out of the difference; 1/std applied in epilogue
            d = p - t
            finite = (jnp.abs(t) < jnp.inf).astype(jnp.float32)
            if lane_okf is not None:
                finite = finite * lane_okf
            if center:
                # tws per-sample centering: (p-mean_p)-(t-mean_t) = d - mean_row(d);
                # a non-finite target poisons the whole row (plain mean), so only fully
                # finite rows count (S_real each).
                dv = d if lane_ok is None else jnp.where(lane_ok, d, 0.0)
                mean = jnp.sum(dv, axis=1, keepdims=True) * (1.0 / S_real)
                d = d - mean
                rowsum = jnp.sum(finite, axis=1, keepdims=True)
                row_ok = (rowsum >= float(S_real) - 0.5).astype(jnp.float32)
            ad = jnp.abs(d)
            ad = jnp.where(ad != ad, 0.0, ad)           # nansum semantics
            if center and lane_okf is not None:
                ad = ad * lane_okf
            out_ref[0, plane] += fold(ad)
            if center:
                out_ref[0, plane + 1, :, 0:1] += fold(row_ok)   # fully-finite row count
            else:
                out_ref[0, plane + 1] += fold(finite)

        accum_task(0, tws_p, tws_t, center=True)
        accum_task(2, et_p, et_t)
        accum_task(4, swe_p, swe_t, clamp=clamp_max)
        accum_task(6, q_p, q_t)

        # ---- cwd top-quantile positive constraint: sum_rows relu(-top_k(row)) --------
        x = cwd_ref[...].astype(jnp.float32)
        if lane_ok is not None:
            x = jnp.where(lane_ok, x, -jnp.inf)         # padded lanes never selected
        pos_cnt = jnp.sum((x >= 0.0).astype(jnp.float32), axis=1, keepdims=True)
        need = jnp.maximum(float(k) - pos_cnt, 0.0)     # negatives needed per row

        # Rows with >= k non-negative entries contribute exactly 0 -> skip entirely.
        @pl.when(jnp.max(need) > 0.0)
        def _constraint():
            neg = jnp.where(x < 0.0, x, -jnp.inf)       # only negatives can contribute

            def cond(carry):
                it, _, _, left = carry
                return jnp.logical_and(it < k, jnp.max(left) > 0.0)

            def body(carry):
                it, acc_rows, xc, left = carry
                m = jnp.max(xc, axis=1, keepdims=True)                       # (bt, 1)
                eq = xc == m
                dup = jnp.sum(eq.astype(jnp.float32), axis=1, keepdims=True)  # tie count
                take = jnp.minimum(left, dup)
                acc_rows = acc_rows + jnp.where(take > 0.0, take * (-m), 0.0)
                xc = jnp.where(eq, -jnp.inf, xc)
                return it + 1, acc_rows, xc, left - take

            _, acc_rows, _, _ = lax.while_loop(
                cond, body,
                (jnp.int32(0), jnp.zeros((bt, 1), jnp.float32), neg, need))
            out_ref[0, 8, :, 0:1] += fold(acc_rows)

    return kernel


def fused_mtloss_partials(arrays, *, S_real, S_pad, k, clamp_max, bt, n_inner):
    in_spec = pl.BlockSpec((bt, S_pad), lambda p, i: (p * n_inner + i, 0))
    out_spec = pl.BlockSpec((1, _NPLANES, _SUBLANE, S_pad), lambda p, i: (p, 0, 0, 0))
    return pl.pallas_call(
        _make_kernel(S_real, S_pad, k, float(clamp_max)),
        out_shape=jax.ShapeDtypeStruct((_N_PAR, _NPLANES, _SUBLANE, S_pad), jnp.float32),
        grid=(_N_PAR, n_inner),
        in_specs=[in_spec] * 9,
        out_specs=out_spec,
        compiler_params=pltpu.CompilerParams(
            dimension_semantics=("parallel", "arbitrary"),
            vmem_limit_bytes=_VMEM_LIMIT_BYTES),
    )(*arrays)


# ----------------------------------------------------------------------------
# MTloss forward (thin jitted wrapper + epilogue around the single fused kernel)
# ----------------------------------------------------------------------------
def mtloss_forward(pred, target, loss_sigmas, step, *, data_stats,
                   task_weighting=False, swe_saturation_threshold=120.0,
                   cwd_top_quantile=0.1):
    cwd = pred['cwd'][..., 0]                          # squeeze trailing channel
    B, S = cwd.shape
    k = int(cwd_top_quantile * S)
    assert k >= 1, "sequence too short for the chosen top quantile"

    S_pad = -(-S // _LANE) * _LANE                     # lane-dense last dim
    bt, n_inner, B_pad = _choose_tiling(B, S_pad)

    nan = float('nan')
    padded = []
    for t in _TASKS:
        padded.append(_pad2d(pred[t + '_agg'][..., 0], B_pad, S_pad, 0.0))
        padded.append(_pad2d(target[t][..., 0], B_pad, S_pad, nan))   # count-neutral pad
    padded.append(_pad2d(cwd, B_pad, S_pad, 0.0))       # constraint-neutral rows

    out = fused_mtloss_partials(padded, S_real=S, S_pad=S_pad, k=k,
                                clamp_max=swe_saturation_threshold,
                                bt=bt, n_inner=n_inner)
    planes = jnp.sum(out, axis=(0, 2, 3))               # (9,) — single cross-lane reduce

    total_u = jnp.zeros((), jnp.float32)
    total_w = jnp.zeros((), jnp.float32)
    for idx, t in enumerate(_TASKS):
        std = float(data_stats[t]['std'])                # data mean cancels in (P - T)
        cnt = planes[2 * idx + 1]
        if t == 'tws':
            cnt = cnt * float(S)                         # plane holds fully-finite rows
        u = planes[2 * idx] / (cnt * std)
        sigma = loss_sigmas[t]
        s = jnp.log(sigma ** 2)
        w = 0.5 * jnp.exp(-s)
        r = 0.5 * s
        total_u = total_u + u
        total_w = total_w + (u * w + r)[0]

    # constraint task: cwd
    mixing = 1.0 - jax.nn.sigmoid((step - 30.0) / 4.0)   # (1,)
    u = (planes[8] / float(B * k)) * mixing + 0.1
    u = u[0]
    sigma = loss_sigmas['cwd']
    s = jnp.log(sigma ** 2)
    w = 0.5 * jnp.exp(-s)
    r = 0.5 * s
    total_u = total_u + u
    total_w = total_w + (u * w + r)[0]

    # TODO(synk): EpochLogger bookkeeping, .item() logging and the backward-hook step
    # counter are host-side side effects with no Pallas equivalent; not translated.
    return total_w if task_weighting else total_u


# ----------------------------------------------------------------------------
# Pure-JAX reference (mirrors the PyTorch semantics) for validation
# ----------------------------------------------------------------------------
def mtloss_forward_ref(pred, target, loss_sigmas, data_stats, step,
                       swe_saturation_threshold=120.0):
    total_u = jnp.zeros((), jnp.float32)
    total_w = jnp.zeros((), jnp.float32)
    for task in _TASKS:
        P = pred[task + '_agg']
        T = target[task]
        if task == 'swe':
            P = jnp.minimum(P, swe_saturation_threshold)
            T = jnp.minimum(T, swe_saturation_threshold)
        P = (P - data_stats[task]['mean']) / data_stats[task]['std']
        T = (T - data_stats[task]['mean']) / data_stats[task]['std']
        if task == 'tws':
            P = P - jnp.mean(P, axis=(1, 2), keepdims=True)
            T = T - jnp.mean(T, axis=(1, 2), keepdims=True)
        cnt = jnp.sum(jnp.any(jnp.isfinite(T), axis=-1).astype(T.dtype))
        ad = jnp.abs(P - T)
        u = jnp.sum(jnp.where(jnp.isnan(ad), 0.0, ad)) / cnt
        sigma = loss_sigmas[task]
        s = jnp.log(sigma ** 2); w = 0.5 * jnp.exp(-s); r = 0.5 * s
        total_u = total_u + u
        total_w = total_w + (u * w + r)[0]

    mixing = 1.0 - jax.nn.sigmoid((step - 30.0) / 4.0)
    x = pred['cwd'][..., 0]
    k = int(0.1 * x.shape[1])
    topv = lax.top_k(x, k)[0]
    constr = jnp.mean(jnp.maximum(-topv, 0.0))
    u = (constr * mixing + 0.1)[0]
    sigma = loss_sigmas['cwd']
    s = jnp.log(sigma ** 2); w = 0.5 * jnp.exp(-s); r = 0.5 * s
    total_u = total_u + u
    total_w = total_w + (u * w + r)[0]
    return total_u, total_w


# ----------------------------------------------------------------------------
if __name__ == "__main__":
    # B=14, S=32 exercises both batch padding (-> 16 rows) and lane padding (-> 128).
    B, S = 14, 32                 # k = int(0.1 * 32) = 3

    key = jax.random.PRNGKey(0)
    keys = jax.random.split(key, 10)

    pred = {
        'tws_agg': jax.random.normal(keys[0], (B, S, 1), jnp.float32) * 2.0 + 1.0,
        'et_agg':  jax.random.normal(keys[1], (B, S, 1), jnp.float32) * 1.5 + 0.5,
        'swe_agg': jax.random.normal(keys[2], (B, S, 1), jnp.float32) * 60.0 + 40.0,
        'q_agg':   jax.random.normal(keys[3], (B, S, 1), jnp.float32) * 0.8 + 0.2,
        'cwd':     jax.random.normal(keys[4], (B, S, 1), jnp.float32) - 2.0,
    }
    target = {
        'tws': jax.random.normal(keys[5], (B, S, 1), jnp.float32) * 2.0 + 1.0,
        'et':  jax.random.normal(keys[6], (B, S, 1), jnp.float32) * 1.5 + 0.5,
        'swe': jax.random.normal(keys[7], (B, S, 1), jnp.float32) * 60.0 + 40.0,
        'q':   jax.random.normal(keys[8], (B, S, 1), jnp.float32) * 0.8 + 0.2,
    }
    # NaN handling: element-wise NaNs for et/q, whole-row poisoning for tws (centered)
    target['et'] = target['et'].at[0, 3, 0].set(jnp.nan)
    target['q'] = target['q'].at[9, 5, 0].set(jnp.nan)
    target['tws'] = target['tws'].at[1, 7, 0].set(jnp.nan)
    target['tws'] = target['tws'].at[12, 2, 0].set(jnp.nan)

    data_stats = {
        'tws': {'mean': 1.0, 'std': 2.0},
        'et':  {'mean': 0.5, 'std': 1.5},
        'swe': {'mean': 30.0, 'std': 50.0},
        'q':   {'mean': 0.2, 'std': 0.8},
    }
    # deterministic parameter init (module __init__: sigma=0.7 per task, step=0)
    loss_sigmas = {t: jnp.ones((1,), jnp.float32) * 0.7
                   for t in ['tws', 'et', 'swe', 'q', 'cwd', 'snow']}
    step = jnp.zeros((1,), jnp.float32)

    fwd_u = jax.jit(functools.partial(mtloss_forward, data_stats=data_stats,
                                      task_weighting=False))
    fwd_w = jax.jit(functools.partial(mtloss_forward, data_stats=data_stats,
                                      task_weighting=True))
    loss_u = jax.block_until_ready(fwd_u(pred, target, loss_sigmas, step))
    loss_w = jax.block_until_ready(fwd_w(pred, target, loss_sigmas, step))

    ref_u, ref_w = mtloss_forward_ref(pred, target, loss_sigmas, data_stats, step)
    ref_u, ref_w = jax.block_until_ready((ref_u, ref_w))

    np.testing.assert_allclose(np.asarray(loss_u), np.asarray(ref_u),
                               rtol=1e-4, atol=1e-4)
    np.testing.assert_allclose(np.asarray(loss_w), np.asarray(ref_w),
                               rtol=1e-4, atol=1e-4)
    print("KERNEL_OK")
</pallas_src>

<mosaic_0001>
module attributes {stable_mosaic.version = 11 : i64} {
  func.func @kernel(%arg0: i32, %arg1: i32, %arg2: memref<8x128xf32, #tpu.memory_space<vmem>>, %arg3: memref<8x128xf32, #tpu.memory_space<vmem>>, %arg4: memref<8x128xf32, #tpu.memory_space<vmem>>, %arg5: memref<8x128xf32, #tpu.memory_space<vmem>>, %arg6: memref<8x128xf32, #tpu.memory_space<vmem>>, %arg7: memref<8x128xf32, #tpu.memory_space<vmem>>, %arg8: memref<8x128xf32, #tpu.memory_space<vmem>>, %arg9: memref<8x128xf32, #tpu.memory_space<vmem>>, %arg10: memref<8x128xf32, #tpu.memory_space<vmem>>, %arg11: memref<1x9x8x128xf32, #tpu.memory_space<vmem>>) attributes {dimension_semantics = [#tpu.dimension_semantics<parallel>, #tpu.dimension_semantics<arbitrary>], iteration_bounds = array<i64: 2, 1>, scalar_prefetch = 0 : i64, scratch_operands = 0 : i64, tpu.core_type = #tpu.core_type<tc>, window_params = [{transform_indices = @transform_0, window_bounds = array<i64: 8, 128>}, {transform_indices = @transform_1, window_bounds = array<i64: 8, 128>}, {transform_indices = @transform_2, window_bounds = array<i64: 8, 128>}, {transform_indices = @transform_3, window_bounds = array<i64: 8, 128>}, {transform_indices = @transform_4, window_bounds = array<i64: 8, 128>}, {transform_indices = @transform_5, window_bounds = array<i64: 8, 128>}, {transform_indices = @transform_6, window_bounds = array<i64: 8, 128>}, {transform_indices = @transform_7, window_bounds = array<i64: 8, 128>}, {transform_indices = @transform_8, window_bounds = array<i64: 8, 128>}, {transform_indices = @transform_9, window_bounds = array<i64: 1, 9, 8, 128>}]} {
    %c0_i32 = arith.constant 0 : i32
    %0 = arith.cmpi eq, %arg1, %c0_i32 : i32
    %1 = arith.extui %0 : i1 to i32
    %c0_i32_0 = arith.constant 0 : i32
    %2 = arith.cmpi ne, %1, %c0_i32_0 : i32
    scf.if %2 {
      %cst_97 = arith.constant 0.000000e+00 : f32
      %147 = vector.broadcast %cst_97 : f32 to vector<1x9x8x128xf32>
      %c0_98 = arith.constant 0 : index
      %c0_99 = arith.constant 0 : index
      %c0_100 = arith.constant 0 : index
      %c0_101 = arith.constant 0 : index
      %148 = vector.load %arg11[%c0_98, %c0_99, %c0_100, %c0_101] : memref<1x9x8x128xf32, #tpu.memory_space<vmem>>, vector<1x9x8x128xf32>
      tpu.vector_store %arg11[%c0_98, %c0_99, %c0_100, %c0_101], %147 {strides = array<i32>} : memref<1x9x8x128xf32, #tpu.memory_space<vmem>>, vector<1x9x8x128xf32>,
    } else {
    }
    %3 = tpu.iota {dimensions = array<i32: 1>} : vector<8x128xi32>
    %c32_i32 = arith.constant 32 : i32
    %4 = vector.broadcast %c32_i32 : i32 to vector<8x128xi32>
    %5 = arith.cmpi slt, %3, %4 : vector<8x128xi32>
    %6 = arith.extui %5 : vector<8x128xi1> to vector<8x128xi32>
    %7 = arith.sitofp %6 : vector<8x128xi32> to vector<8x128xf32>
    %c0 = arith.constant 0 : index
    %c0_1 = arith.constant 0 : index
    %8 = vector.load %arg2[%c0, %c0_1] : memref<8x128xf32, #tpu.memory_space<vmem>>, vector<8x128xf32>
    %c0_2 = arith.constant 0 : index
    %c0_3 = arith.constant 0 : index
    %9 = vector.load %arg3[%c0_2, %c0_3] : memref<8x128xf32, #tpu.memory_space<vmem>>, vector<8x128xf32>
    %10 = arith.subf %8, %9 : vector<8x128xf32>
    %11 = math.absf %9 : vector<8x128xf32>
    %cst = arith.constant 0x7F800000 : f32
    %12 = vector.broadcast %cst : f32 to vector<8x128xf32>
    %13 = arith.cmpf olt, %11, %12 : vector<8x128xf32>
    %14 = arith.extui %13 : vector<8x128xi1> to vector<8x128xi32>
    %15 = arith.sitofp %14 : vector<8x128xi32> to vector<8x128xf32>
    %16 = arith.mulf %15, %7 : vector<8x128xf32>
    %cst_4 = arith.constant 0.000000e+00 : f32
    %17 = vector.broadcast %cst_4 : f32 to vector<8x128xf32>
    %18 = arith.select %5, %10, %17 : vector<8x128xi1>, vector<8x128xf32>
    %cst_5 = arith.constant dense<0.000000e+00> : vector<8xf32>
    %19 = vector.multi_reduction <add>, %18, %cst_5 [1] : vector<8x128xf32> to vector<8xf32>
    %20 = vector.shape_cast %19 : vector<8xf32> to vector<8x1xf32>
    %cst_6 = arith.constant 3.125000e-02 : f32
    %21 = vector.broadcast %cst_6 : f32 to vector<8x1xf32>
    %22 = arith.mulf %20, %21 : vector<8x1xf32>
    %23 = vector.broadcast %22 : vector<8x1xf32> to vector<8x128xf32>
    %24 = arith.subf %10, %23 : vector<8x128xf32>
    %cst_7 = arith.constant dense<0.000000e+00> : vector<8xf32>
    %25 = vector.multi_reduction <add>, %16, %cst_7 [1] : vector<8x128xf32> to vector<8xf32>
    %26 = vector.shape_cast %25 : vector<8xf32> to vector<8x1xf32>
    %cst_8 = arith.constant 3.150000e+01 : f32
    %27 = vector.broadcast %cst_8 : f32 to vector<8x1xf32>
    %28 = arith.cmpf oge, %26, %27 : vector<8x1xf32>
    %29 = arith.extui %28 : vector<8x1xi1> to vector<8x1xi32>
    %30 = arith.sitofp %29 : vector<8x1xi32> to vector<8x1xf32>
    %31 = math.absf %24 : vector<8x128xf32>
    %32 = arith.cmpf one, %31, %31 : vector<8x128xf32>
    %cst_9 = arith.constant 0.000000e+00 : f32
    %33 = vector.broadcast %cst_9 : f32 to vector<8x128xf32>
    %34 = arith.select %32, %33, %31 : vector<8x128xi1>, vector<8x128xf32>
    %35 = arith.mulf %34, %7 : vector<8x128xf32>
    %c0_10 = arith.constant 0 : index
    %c0_11 = arith.constant 0 : index
    %c0_12 = arith.constant 0 : index
    %c0_13 = arith.constant 0 : index
    %36 = vector.load %arg11[%c0_10, %c0_11, %c0_12, %c0_13] : memref<1x9x8x128xf32, #tpu.memory_space<vmem>>, vector<1x1x8x128xf32>
    %37 = vector.shape_cast %36 : vector<1x1x8x128xf32> to vector<8x128xf32>
    %38 = arith.addf %37, %35 : vector<8x128xf32>
    %c0_14 = arith.constant 0 : index
    %c0_15 = arith.constant 0 : index
    %c0_16 = arith.constant 0 : index
    %c0_17 = arith.constant 0 : index
    %39 = vector.load %arg11[%c0_14, %c0_15, %c0_16, %c0_17] : memref<1x9x8x128xf32, #tpu.memory_space<vmem>>, vector<1x1x8x128xf32>
    %40 = vector.shape_cast %39 : vector<1x1x8x128xf32> to vector<8x128xf32>
    %41 = vector.shape_cast %38 : vector<8x128xf32> to vector<1x1x8x128xf32>
    tpu.vector_store %arg11[%c0_14, %c0_15, %c0_16, %c0_17], %41 {strides = array<i32>} : memref<1x9x8x128xf32, #tpu.memory_space<vmem>>, vector<1x1x8x128xf32>,
    %c0_18 = arith.constant 0 : index
    %c1 = arith.constant 1 : index
    %c0_19 = arith.constant 0 : index
    %c0_20 = arith.constant 0 : index
    %42 = vector.load %arg11[%c0_18, %c1, %c0_19, %c0_20] : memref<1x9x8x128xf32, #tpu.memory_space<vmem>>, vector<1x1x8x1xf32>
    %43 = vector.shape_cast %42 : vector<1x1x8x1xf32> to vector<8x1xf32>
    %44 = arith.addf %43, %30 : vector<8x1xf32>
    %c0_21 = arith.constant 0 : index
    %c1_22 = arith.constant 1 : index
    %c0_23 = arith.constant 0 : index
    %c0_24 = arith.constant 0 : index
    %45 = vector.load %arg11[%c0_21, %c1_22, %c0_23, %c0_24] : memref<1x9x8x128xf32, #tpu.memory_space<vmem>>, vector<1x1x8x1xf32>
    %46 = vector.shape_cast %45 : vector<1x1x8x1xf32> to vector<8x1xf32>
    %47 = vector.shape_cast %44 : vector<8x1xf32> to vector<1x1x8x1xf32>
    tpu.vector_store %arg11[%c0_21, %c1_22, %c0_23, %c0_24], %47 {strides = array<i32>} : memref<1x9x8x128xf32, #tpu.memory_space<vmem>>, vector<1x1x8x1xf32>,
    %c0_25 = arith.constant 0 : index
    %c0_26 = arith.constant 0 : index
    %48 = vector.load %arg4[%c0_25, %c0_26] : memref<8x128xf32, #tpu.memory_space<vmem>>, vector<8x128xf32>
    %c0_27 = arith.constant 0 : index
    %c0_28 = arith.constant 0 : index
    %49 = vector.load %arg5[%c0_27, %c0_28] : memref<8x128xf32, #tpu.memory_space<vmem>>, vector<8x128xf32>
    %50 = arith.subf %48, %49 : vector<8x128xf32>
    %51 = math.absf %49 : vector<8x128xf32>
    %cst_29 = arith.constant 0x7F800000 : f32
    %52 = vector.broadcast %cst_29 : f32 to vector<8x128xf32>
    %53 = arith.cmpf olt, %51, %52 : vector<8x128xf32>
    %54 = arith.extui %53 : vector<8x128xi1> to vector<8x128xi32>
    %55 = arith.sitofp %54 : vector<8x128xi32> to vector<8x128xf32>
    %56 = arith.mulf %55, %7 : vector<8x128xf32>
    %57 = math.absf %50 : vector<8x128xf32>
    %58 = arith.cmpf one, %57, %57 : vector<8x128xf32>
    %cst_30 = arith.constant 0.000000e+00 : f32
    %59 = vector.broadcast %cst_30 : f32 to vector<8x128xf32>
    %60 = arith.select %58, %59, %57 : vector<8x128xi1>, vector<8x128xf32>
    %c0_31 = arith.constant 0 : index
    %c2 = arith.constant 2 : index
    %c0_32 = arith.constant 0 : index
    %c0_33 = arith.constant 0 : index
    %61 = vector.load %arg11[%c0_31, %c2, %c0_32, %c0_33] : memref<1x9x8x128xf32, #tpu.memory_space<vmem>>, vector<1x1x8x128xf32>
    %62 = vector.shape_cast %61 : vector<1x1x8x128xf32> to vector<8x128xf32>
    %63 = arith.addf %62, %60 : vector<8x128xf32>
    %c0_34 = arith.constant 0 : index
    %c2_35 = arith.constant 2 : index
    %c0_36 = arith.constant 0 : index
    %c0_37 = arith.constant 0 : index
    %64 = vector.load %arg11[%c0_34, %c2_35, %c0_36, %c0_37] : memref<1x9x8x128xf32, #tpu.memory_space<vmem>>, vector<1x1x8x128xf32>
    %65 = vector.shape_cast %64 : vector<1x1x8x128xf32> to vector<8x128xf32>
    %66 = vector.shape_cast %63 : vector<8x128xf32> to vector<1x1x8x128xf32>
    tpu.vector_store %arg11[%c0_34, %c2_35, %c0_36, %c0_37], %66 {strides = array<i32>} : memref<1x9x8x128xf32, #tpu.memory_space<vmem>>, vector<1x1x8x128xf32>,
    %c0_38 = arith.constant 0 : index
    %c3 = arith.constant 3 : index
    %c0_39 = arith.constant 0 : index
    %c0_40 = arith.constant 0 : index
    %67 = vector.load %arg11[%c0_38, %c3, %c0_39, %c0_40] : memref<1x9x8x128xf32, #tpu.memory_space<vmem>>, vector<1x1x8x128xf32>
    %68 = vector.shape_cast %67 : vector<1x1x8x128xf32> to vector<8x128xf32>
    %69 = arith.addf %68, %56 : vector<8x128xf32>
    %c0_41 = arith.constant 0 : index
    %c3_42 = arith.constant 3 : index
    %c0_43 = arith.constant 0 : index
    %c0_44 = arith.constant 0 : index
    %70 = vector.load %arg11[%c0_41, %c3_42, %c0_43, %c0_44] : memref<1x9x8x128xf32, #tpu.memory_space<vmem>>, vector<1x1x8x128xf32>
    %71 = vector.shape_cast %70 : vector<1x1x8x128xf32> to vector<8x128xf32>
    %72 = vector.shape_cast %69 : vector<8x128xf32> to vector<1x1x8x128xf32>
    tpu.vector_store %arg11[%c0_41, %c3_42, %c0_43, %c0_44], %72 {strides = array<i32>} : memref<1x9x8x128xf32, #tpu.memory_space<vmem>>, vector<1x1x8x128xf32>,
    %c0_45 = arith.constant 0 : index
    %c0_46 = arith.constant 0 : index
    %73 = vector.load %arg6[%c0_45, %c0_46] : memref<8x128xf32, #tpu.memory_space<vmem>>, vector<8x128xf32>
    %c0_47 = arith.constant 0 : index
    %c0_48 = arith.constant 0 : index
    %74 = vector.load %arg7[%c0_47, %c0_48] : memref<8x128xf32, #tpu.memory_space<vmem>>, vector<8x128xf32>
    %cst_49 = arith.constant 1.200000e+02 : f32
    %75 = vector.broadcast %cst_49 : f32 to vector<8x128xf32>
    %76 = arith.minimumf %73, %75 : vector<8x128xf32>
    %cst_50 = arith.constant 1.200000e+02 : f32
    %77 = vector.broadcast %cst_50 : f32 to vector<8x128xf32>
    %78 = arith.minimumf %74, %77 : vector<8x128xf32>
    %79 = arith.subf %76, %78 : vector<8x128xf32>
    %80 = math.absf %78 : vector<8x128xf32>
    %cst_51 = arith.constant 0x7F800000 : f32
    %81 = vector.broadcast %cst_51 : f32 to vector<8x128xf32>
    %82 = arith.cmpf olt, %80, %81 : vector<8x128xf32>
    %83 = arith.extui %82 : vector<8x128xi1> to vector<8x128xi32>
    %84 = arith.sitofp %83 : vector<8x128xi32> to vector<8x128xf32>
    %85 = arith.mulf %84, %7 : vector<8x128xf32>
    %86 = math.absf %79 : vector<8x128xf32>
    %87 = arith.cmpf one, %86, %86 : vector<8x128xf32>
    %cst_52 = arith.constant 0.000000e+00 : f32
    %88 = vector.broadcast %cst_52 : f32 to vector<8x128xf32>
    %89 = arith.select %87, %88, %86 : vector<8x128xi1>, vector<8x128xf32>
    %c0_53 = arith.constant 0 : index
    %c4 = arith.constant 4 : index
    %c0_54 = arith.constant 0 : index
    %c0_55 = arith.constant 0 : index
    %90 = vector.load %arg11[%c0_53, %c4, %c0_54, %c0_55] : memref<1x9x8x128xf32, #tpu.memory_space<vmem>>, vector<1x1x8x128xf32>
    %91 = vector.shape_cast %90 : vector<1x1x8x128xf32> to vector<8x128xf32>
    %92 = arith.addf %91, %89 : vector<8x128xf32>
    %c0_56 = arith.constant 0 : index
    %c4_57 = arith.constant 4 : index
    %c0_58 = arith.constant 0 : index
    %c0_59 = arith.constant 0 : index
    %93 = vector.load %arg11[%c0_56, %c4_57, %c0_58, %c0_59] : memref<1x9x8x128xf32, #tpu.memory_space<vmem>>, vector<1x1x8x128xf32>
    %94 = vector.shape_cast %93 : vector<1x1x8x128xf32> to vector<8x128xf32>
    %95 = vector.shape_cast %92 : vector<8x128xf32> to vector<1x1x8x128xf32>
    tpu.vector_store %arg11[%c0_56, %c4_57, %c0_58, %c0_59], %95 {strides = array<i32>} : memref<1x9x8x128xf32, #tpu.memory_space<vmem>>, vector<1x1x8x128xf32>,
    %c0_60 = arith.constant 0 : index
    %c5 = arith.constant 5 : index
    %c0_61 = arith.constant 0 : index
    %c0_62 = arith.constant 0 : index
    %96 = vector.load %arg11[%c0_60, %c5, %c0_61, %c0_62] : memref<1x9x8x128xf32, #tpu.memory_space<vmem>>, vector<1x1x8x128xf32>
    %97 = vector.shape_cast %96 : vector<1x1x8x128xf32> to vector<8x128xf32>
    %98 = arith.addf %97, %85 : vector<8x128xf32>
    %c0_63 = arith.constant 0 : index
    %c5_64 = arith.constant 5 : index
    %c0_65 = arith.constant 0 : index
    %c0_66 = arith.constant 0 : index
    %99 = vector.load %arg11[%c0_63, %c5_64, %c0_65, %c0_66] : memref<1x9x8x128xf32, #tpu.memory_space<vmem>>, vector<1x1x8x128xf32>
    %100 = vector.shape_cast %99 : vector<1x1x8x128xf32> to vector<8x128xf32>
    %101 = vector.shape_cast %98 : vector<8x128xf32> to vector<1x1x8x128xf32>
    tpu.vector_store %arg11[%c0_63, %c5_64, %c0_65, %c0_66], %101 {strides = array<i32>} : memref<1x9x8x128xf32, #tpu.memory_space<vmem>>, vector<1x1x8x128xf32>,
    %c0_67 = arith.constant 0 : index
    %c0_68 = arith.constant 0 : index
    %102 = vector.load %arg8[%c0_67, %c0_68] : memref<8x128xf32, #tpu.memory_space<vmem>>, vector<8x128xf32>
    %c0_69 = arith.constant 0 : index
    %c0_70 = arith.constant 0 : index
    %103 = vector.load %arg9[%c0_69, %c0_70] : memref<8x128xf32, #tpu.memory_space<vmem>>, vector<8x128xf32>
    %104 = arith.subf %102, %103 : vector<8x128xf32>
    %105 = math.absf %103 : vector<8x128xf32>
    %cst_71 = arith.constant 0x7F800000 : f32
    %106 = vector.broadcast %cst_71 : f32 to vector<8x128xf32>
    %107 = arith.cmpf olt, %105, %106 : vector<8x128xf32>
    %108 = arith.extui %107 : vector<8x128xi1> to vector<8x128xi32>
    %109 = arith.sitofp %108 : vector<8x128xi32> to vector<8x128xf32>
    %110 = arith.mulf %109, %7 : vector<8x128xf32>
    %111 = math.absf %104 : vector<8x128xf32>
    %112 = arith.cmpf one, %111, %111 : vector<8x128xf32>
    %cst_72 = arith.constant 0.000000e+00 : f32
    %113 = vector.broadcast %cst_72 : f32 to vector<8x128xf32>
    %114 = arith.select %112, %113, %111 : vector<8x128xi1>, vector<8x128xf32>
    %c0_73 = arith.constant 0 : index
    %c6 = arith.constant 6 : index
    %c0_74 = arith.constant 0 : index
    %c0_75 = arith.constant 0 : index
    %115 = vector.load %arg11[%c0_73, %c6, %c0_74, %c0_75] : memref<1x9x8x128xf32, #tpu.memory_space<vmem>>, vector<1x1x8x128xf32>
    %116 = vector.shape_cast %115 : vector<1x1x8x128xf32> to vector<8x128xf32>
    %117 = arith.addf %116, %114 : vector<8x128xf32>
    %c0_76 = arith.constant 0 : index
    %c6_77 = arith.constant 6 : index
    %c0_78 = arith.constant 0 : index
    %c0_79 = arith.constant 0 : index
    %118 = vector.load %arg11[%c0_76, %c6_77, %c0_78, %c0_79] : memref<1x9x8x128xf32, #tpu.memory_space<vmem>>, vector<1x1x8x128xf32>
    %119 = vector.shape_cast %118 : vector<1x1x8x128xf32> to vector<8x128xf32>
    %120 = vector.shape_cast %117 : vector<8x128xf32> to vector<1x1x8x128xf32>
    tpu.vector_store %arg11[%c0_76, %c6_77, %c0_78, %c0_79], %120 {strides = array<i32>} : memref<1x9x8x128xf32, #tpu.memory_space<vmem>>, vector<1x1x8x128xf32>,
    %c0_80 = arith.constant 0 : index
    %c7 = arith.constant 7 : index
    %c0_81 = arith.constant 0 : index
    %c0_82 = arith.constant 0 : index
    %121 = vector.load %arg11[%c0_80, %c7, %c0_81, %c0_82] : memref<1x9x8x128xf32, #tpu.memory_space<vmem>>, vector<1x1x8x128xf32>
    %122 = vector.shape_cast %121 : vector<1x1x8x128xf32> to vector<8x128xf32>
    %123 = arith.addf %122, %110 : vector<8x128xf32>
    %c0_83 = arith.constant 0 : index
    %c7_84 = arith.constant 7 : index
    %c0_85 = arith.constant 0 : index
    %c0_86 = arith.constant 0 : index
    %124 = vector.load %arg11[%c0_83, %c7_84, %c0_85, %c0_86] : memref<1x9x8x128xf32, #tpu.memory_space<vmem>>, vector<1x1x8x128xf32>
    %125 = vector.shape_cast %124 : vector<1x1x8x128xf32> to vector<8x128xf32>
    %126 = vector.shape_cast %123 : vector<8x128xf32> to vector<1x1x8x128xf32>
    tpu.vector_store %arg11[%c0_83, %c7_84, %c0_85, %c0_86], %126 {strides = array<i32>} : memref<1x9x8x128xf32, #tpu.memory_space<vmem>>, vector<1x1x8x128xf32>,
    %c0_87 = arith.constant 0 : index
    %c0_88 = arith.constant 0 : index
    %127 = vector.load %arg10[%c0_87, %c0_88] : memref<8x128xf32, #tpu.memory_space<vmem>>, vector<8x128xf32>
    %cst_89 = arith.constant 0xFF800000 : f32
    %128 = vector.broadcast %cst_89 : f32 to vector<8x128xf32>
    %129 = arith.select %5, %127, %128 : vector<8x128xi1>, vector<8x128xf32>
    %cst_90 = arith.constant 0.000000e+00 : f32
    %130 = vector.broadcast %cst_90 : f32 to vector<8x128xf32>
    %131 = arith.cmpf oge, %129, %130 : vector<8x128xf32>
    %132 = arith.extui %131 : vector<8x128xi1> to vector<8x128xi32>
    %133 = arith.sitofp %132 : vector<8x128xi32> to vector<8x128xf32>
    %cst_91 = arith.constant dense<0.000000e+00> : vector<8xf32>
    %134 = vector.multi_reduction <add>, %133, %cst_91 [1] : vector<8x128xf32> to vector<8xf32>
    %135 = vector.shape_cast %134 : vector<8xf32> to vector<8x1xf32>
    %cst_92 = arith.constant 3.000000e+00 : f32
    %136 = vector.broadcast %cst_92 : f32 to vector<8x1xf32>
    %137 = arith.subf %136, %135 : vector<8x1xf32>
    %cst_93 = arith.constant 0.000000e+00 : f32
    %138 = vector.broadcast %cst_93 : f32 to vector<8x1xf32>
    %139 = arith.maximumf %137, %138 : vector<8x1xf32>
    %140 = vector.shape_cast %139 : vector<8x1xf32> to vector<1x8x1xf32>
    %cst_94 = arith.constant dense<0xFF800000> : vector<1xf32>
    %141 = vector.multi_reduction <maximumf>, %140, %cst_94 [1, 2] : vector<1x8x1xf32> to vector<1xf32>
    %142 = vector.shape_cast %141 : vector<1xf32> to vector<1x1x1xf32>
    %143 = vector.extract %142[0, 0, 0] : f32 from vector<1x1x1xf32>
    %cst_95 = arith.constant 0.000000e+00 : f32
    %144 = arith.cmpf ogt, %143, %cst_95 : f32
    %145 = arith.extui %144 : i1 to i32
    %c0_i32_96 = arith.constant 0 : i32
    %146 = arith.cmpi ne, %145, %c0_i32_96 : i32
    scf.if %146 {
      %cst_97 = arith.constant 0.000000e+00 : f32
      %147 = vector.broadcast %cst_97 : f32 to vector<8x128xf32>
      %148 = arith.cmpf olt, %129, %147 : vector<8x128xf32>
      %cst_98 = arith.constant 0xFF800000 : f32
      %149 = vector.broadcast %cst_98 : f32 to vector<8x128xf32>
      %150 = arith.select %148, %129, %149 : vector<8x128xi1>, vector<8x128xf32>
      %cst_99 = arith.constant 0.000000e+00 : f32
      %151 = vector.broadcast %cst_99 : f32 to vector<8x1xf32>
      %c0_i32_100 = arith.constant 0 : i32
      %152:4 = scf.while (%arg12 = %c0_i32_100, %arg13 = %151, %arg14 = %150, %arg15 = %139) : (i32, vector<8x1xf32>, vector<8x128xf32>, vector<8x1xf32>) -> (i32, vector<8x1xf32>, vector<8x128xf32>, vector<8x1xf32>) {
        %c3_i32 = arith.constant 3 : i32
        %159 = arith.cmpi slt, %arg12, %c3_i32 : i32
        %160 = vector.shape_cast %arg15 : vector<8x1xf32> to vector<1x8x1xf32>
        %cst_108 = arith.constant dense<0xFF800000> : vector<1xf32>
        %161 = vector.multi_reduction <maximumf>, %160, %cst_108 [1, 2] : vector<1x8x1xf32> to vector<1xf32>
        %162 = vector.shape_cast %161 : vector<1xf32> to vector<1x1x1xf32>
        %163 = vector.extract %162[0, 0, 0] : f32 from vector<1x1x1xf32>
        %cst_109 = arith.constant 0.000000e+00 : f32
        %164 = arith.cmpf ogt, %163, %cst_109 : f32
        %165 = arith.andi %159, %164 : i1
        scf.condition(%165) %arg12, %arg13, %arg14, %arg15 : i32, vector<8x1xf32>, vector<8x128xf32>, vector<8x1xf32>
      } do {
      ^bb0(%arg12: i32, %arg13: vector<8x1xf32>, %arg14: vector<8x128xf32>, %arg15: vector<8x1xf32>):
        %cst_108 = arith.constant dense<0xFF800000> : vector<8xf32>
        %159 = vector.multi_reduction <maximumf>, %arg14, %cst_108 [1] : vector<8x128xf32> to vector<8xf32>
        %160 = vector.shape_cast %159 : vector<8xf32> to vector<8x1xf32>
        %161 = vector.broadcast %160 : vector<8x1xf32> to vector<8x128xf32>
        %162 = arith.cmpf oeq, %arg14, %161 : vector<8x128xf32>
        %163 = arith.extui %162 : vector<8x128xi1> to vector<8x128xi32>
        %164 = arith.sitofp %163 : vector<8x128xi32> to vector<8x128xf32>
        %cst_109 = arith.constant dense<0.000000e+00> : vector<8xf32>
        %165 = vector.multi_reduction <add>, %164, %cst_109 [1] : vector<8x128xf32> to vector<8xf32>
        %166 = vector.shape_cast %165 : vector<8xf32> to vector<8x1xf32>
        %167 = arith.minimumf %arg15, %166 : vector<8x1xf32>
        %cst_110 = arith.constant 0.000000e+00 : f32
        %168 = vector.broadcast %cst_110 : f32 to vector<8x1xf32>
        %169 = arith.cmpf ogt, %167, %168 : vector<8x1xf32>
        %cst_111 = arith.constant 0.000000e+00 : f32
        %170 = vector.broadcast %cst_111 : f32 to vector<8x1xf32>
        %171 = arith.subf %170, %160 : vector<8x1xf32>
        %172 = arith.mulf %167, %171 : vector<8x1xf32>
        %cst_112 = arith.constant 0.000000e+00 : f32
        %173 = vector.broadcast %cst_112 : f32 to vector<8x1xf32>
        %174 = arith.select %169, %172, %173 : vector<8x1xi1>, vector<8x1xf32>
        %175 = arith.addf %arg13, %174 : vector<8x1xf32>
        %cst_113 = arith.constant 0xFF800000 : f32
        %176 = vector.broadcast %cst_113 : f32 to vector<8x128xf32>
        %177 = arith.select %162, %176, %arg14 : vector<8x128xi1>, vector<8x128xf32>
        %c1_i32 = arith.constant 1 : i32
        %178 = arith.addi %arg12, %c1_i32 : i32
        %179 = arith.subf %arg15, %167 : vector<8x1xf32>
        scf.yield %178, %175, %177, %179 : i32, vector<8x1xf32>, vector<8x128xf32>, vector<8x1xf32>
      }
      %c0_101 = arith.constant 0 : index
      %c8 = arith.constant 8 : index
      %c0_102 = arith.constant 0 : index
      %c0_103 = arith.constant 0 : index
      %153 = vector.load %arg11[%c0_101, %c8, %c0_102, %c0_103] : memref<1x9x8x128xf32, #tpu.memory_space<vmem>>, vector<1x1x8x1xf32>
      %154 = vector.shape_cast %153 : vector<1x1x8x1xf32> to vector<8x1xf32>
      %155 = arith.addf %154, %152#1 : vector<8x1xf32>
      %c0_104 = arith.constant 0 : index
      %c8_105 = arith.constant 8 : index
      %c0_106 = arith.constant 0 : index
      %c0_107 = arith.constant 0 : index
      %156 = vector.load %arg11[%c0_104, %c8_105, %c0_106, %c0_107] : memref<1x9x8x128xf32, #tpu.memory_space<vmem>>, vector<1x1x8x1xf32>
      %157 = vector.shape_cast %156 : vector<1x1x8x1xf32> to vector<8x1xf32>
      %158 = vector.shape_cast %155 : vector<8x1xf32> to vector<1x1x8x1xf32>
      tpu.vector_store %arg11[%c0_104, %c8_105, %c0_106, %c0_107], %158 {strides = array<i32>} : memref<1x9x8x128xf32, #tpu.memory_space<vmem>>, vector<1x1x8x1xf32>,
    } else {
    }
    return
  }
  func.func @transform_0(%arg0: i32, %arg1: i32) -> (i32, i32) {
    %c1_i32 = arith.constant 1 : i32
    %0 = arith.muli %arg0, %c1_i32 : i32
    %1 = arith.addi %0, %arg1 : i32
    %c0_i32 = arith.constant 0 : i32
    %c0_i32_0 = arith.constant 0 : i32
    return %1, %c0_i32 : i32, i32
  }
  func.func @transform_1(%arg0: i32, %arg1: i32) -> (i32, i32) {
    %c1_i32 = arith.constant 1 : i32
    %0 = arith.muli %arg0, %c1_i32 : i32
    %1 = arith.addi %0, %arg1 : i32
    %c0_i32 = arith.constant 0 : i32
    %c0_i32_0 = arith.constant 0 : i32
    return %1, %c0_i32 : i32, i32
  }
  func.func @transform_2(%arg0: i32, %arg1: i32) -> (i32, i32) {
    %c1_i32 = arith.constant 1 : i32
    %0 = arith.muli %arg0, %c1_i32 : i32
    %1 = arith.addi %0, %arg1 : i32
    %c0_i32 = arith.constant 0 : i32
    %c0_i32_0 = arith.constant 0 : i32
    return %1, %c0_i32 : i32, i32
  }
  func.func @transform_3(%arg0: i32, %arg1: i32) -> (i32, i32) {
    %c1_i32 = arith.constant 1 : i32
    %0 = arith.muli %arg0, %c1_i32 : i32
    %1 = arith.addi %0, %arg1 : i32
    %c0_i32 = arith.constant 0 : i32
    %c0_i32_0 = arith.constant 0 : i32
    return %1, %c0_i32 : i32, i32
  }
  func.func @transform_4(%arg0: i32, %arg1: i32) -> (i32, i32) {
    %c1_i32 = arith.constant 1 : i32
    %0 = arith.muli %arg0, %c1_i32 : i32
    %1 = arith.addi %0, %arg1 : i32
    %c0_i32 = arith.constant 0 : i32
    %c0_i32_0 = arith.constant 0 : i32
    return %1, %c0_i32 : i32, i32
  }
  func.func @transform_5(%arg0: i32, %arg1: i32) -> (i32, i32) {
    %c1_i32 = arith.constant 1 : i32
    %0 = arith.muli %arg0, %c1_i32 : i32
    %1 = arith.addi %0, %arg1 : i32
    %c0_i32 = arith.constant 0 : i32
    %c0_i32_0 = arith.constant 0 : i32
    return %1, %c0_i32 : i32, i32
  }
  func.func @transform_6(%arg0: i32, %arg1: i32) -> (i32, i32) {
    %c1_i32 = arith.constant 1 : i32
    %0 = arith.muli %arg0, %c1_i32 : i32
    %1 = arith.addi %0, %arg1 : i32
    %c0_i32 = arith.constant 0 : i32
    %c0_i32_0 = arith.constant 0 : i32
    return %1, %c0_i32 : i32, i32
  }
  func.func @transform_7(%arg0: i32, %arg1: i32) -> (i32, i32) {
    %c1_i32 = arith.constant 1 : i32
    %0 = arith.muli %arg0, %c1_i32 : i32
    %1 = arith.addi %0, %arg1 : i32
    %c0_i32 = arith.constant 0 : i32
    %c0_i32_0 = arith.constant 0 : i32
    return %1, %c0_i32 : i32, i32
  }
  func.func @transform_8(%arg0: i32, %arg1: i32) -> (i32, i32) {
    %c1_i32 = arith.constant 1 : i32
    %0 = arith.muli %arg0, %c1_i32 : i32
    %1 = arith.addi %0, %arg1 : i32
    %c0_i32 = arith.constant 0 : i32
    %c0_i32_0 = arith.constant 0 : i32
    return %1, %c0_i32 : i32, i32
  }
  func.func @transform_9(%arg0: i32, %arg1: i32) -> (i32, i32, i32, i32) {
    %c0_i32 = arith.constant 0 : i32
    %c0_i32_0 = arith.constant 0 : i32
    %c0_i32_1 = arith.constant 0 : i32
    %c0_i32_2 = arith.constant 0 : i32
    return %arg0, %c0_i32, %c0_i32_0, %c0_i32_1 : i32, i32, i32, i32
  }
}

</mosaic_0001>

<bundles_post_ra>
// kernel: mtloss_forward.1
= control target key start
LH: loop header
LB: loop body
LE: loop exit
PB: predicated region body
PF: predicated region fallthrough
CT: control target
= control target key end

     0   :  { %s1119_s30 = smov 0   ;;  %s1121_s10 = smov 0   ;;  %s1228_s0 = inlined_call_operand.vmem [shape: f32[16,128], index: 0, kind: input, shape index: {}]   ;;  %s1229_s1 = inlined_call_operand.vmem [shape: f32[16,128], index: 1, kind: input, shape index: {}]   ;;  %s1230_s2 = inlined_call_operand.vmem [shape: f32[16,128], index: 2, kind: input, shape index: {}]   ;;  %s1231_s3 = inlined_call_operand.vmem [shape: f32[16,128], index: 3, kind: input, shape index: {}]   ;;  %s1232_s4 = inlined_call_operand.vmem [shape: f32[16,128], index: 4, kind: input, shape index: {}]   ;;  %s1233_s5 = inlined_call_operand.vmem [shape: f32[16,128], index: 5, kind: input, shape index: {}]   ;;  %s1234_s6 = inlined_call_operand.vmem [shape: f32[16,128], index: 6, kind: input, shape index: {}]   ;;  %s1235_s7 = inlined_call_operand.vmem [shape: f32[16,128], index: 7, kind: input, shape index: {}]   ;;  %s1236_s8 = inlined_call_operand.vmem [shape: f32[16,128], index: 8, kind: input, shape index: {}]   ;;  %s1237_s9 = inlined_call_operand.vmem [shape: f32[2,9,8,128], index: 9, kind: output, shape index: {}]  }
   0x1   :  { %s1123_s11 = smov 0  }
   0x2 LB: > { %s31_s12 = sadd.s32 1, %s1041_s10  ;;  %p894_p0 = scmp.ge.s32.totalorder %s1045_s11, 1  ;;  %s1045_s11 = sphi %s1123_s11, %s19_s11   ;;  %s1041_s10 = sphi %s1121_s10, %s1239_s10   ;;  %s1037_s30 = sphi %s1119_s30, %s1238_s30  }
   0x3   : > { %p33_p1 = scmp.ge.s32.totalorder %s31_s12, 2  ;;  %p406_p2 = scmp.lt.s32.totalorder %s1045_s11, 3 }
   0x5   : > { %s1241_s12 = smov (%p33_p1, %s31_s12), 0  ;;  %p407_p3 = pnand %p894_p0, %p406_p2 }
   0x6   : > { %p483_p4 = scmp.lt.s32.totalorder (!%p407_p3), %s1037_s30, 1  ;;  %v554_v0 = vlaneseq (!%p407_p3)  ;;  %v1067_v4 = vmov (!%p407_p3), 0.0   ;;  %vm587_vm10 = vcmask (!%p407_p3), 7168  }
   0x7   : > { %410 = sbr.rel (%p407_p3) target bundleno = 612 (0x264), region = 56 }
   0x8   : > { %v555_v1 = vand.u32 (!%p407_p3), 127, %v554_v0 }
   0xa   : > { %vm556_vm0 = vcmp.lt.s32.totalorder (!%p407_p3), %v555_v1, 32 }
   0xb   : > { %v905_v19 = vsel (!%p407_p3), %vm556_vm0, 1.0, %v1067_v4 }
   0xe   : > { %s1243_s30 = smov (!%p483_p4, %s1037_s30), 1 }
   0xf   : > { %s1137_s13 = sshll.u32 %s1243_s30, 3  ;;  %s932_s14 = smul.u32 72, %s1243_s30 }
  0x10   : > { %s534_s17 = scalar_lea.vmem %s1236_s8, %s1137_s13  ;;  %s498_s20 = scalar_lea.vmem %s1230_s2, %s1137_s13 }
  0x11   : > { %s1150_s23 = scalar_lea.vmem %s1237_s9, %s932_s14  ;;  %v648_v2 = vld [vmem:[%s534_s17] sm:$0xff]  ;;  %s504_s26 = scalar_lea.vmem %s1231_s3, %s1137_s13 }
  0x12   : > { %v589_v3 = vld [vmem:[%s498_s20] sm:$0xff]  ;;  %553 = vst [vmem:[%s1150_s23 + $0x40] sm:$0xff] %v1067_v4  ;;  %v1159_v5 = vsel %vm556_vm0, %v648_v2, -inf  ;;  %s510_s29 = scalar_lea.vmem %s1232_s4, %s1137_s13  ;;  %s516_s15 = scalar_lea.vmem %s1233_s5, %s1137_s13  ;;  %546 = vst [vmem:[%s1150_s23 + $0x8] sm:$0xff] %v1067_v4 }
  0x13   : > { %v590_v6 = vld [vmem:[%s504_s26] sm:$0xff]  ;;  %vm650_vm1 = vcmp.ge.f32.partialorder %v1159_v5, 0.0  ;;  %s522_s18 = scalar_lea.vmem %s1234_s6, %s1137_s13  ;;  %s528_s21 = scalar_lea.vmem %s1235_s7, %s1137_s13 }
  0x14   : > { %v591_v7 = vsub.f32 %v589_v3, %v590_v6  ;;  %v592_v8 = vand.u32 2147483647, %v590_v6  ;;  %v608_v9 = vld [vmem:[%s510_s29] sm:$0xff]  ;;  %v925_v11 = vsel %vm650_vm1, 1.0, %v1067_v4  ;;  %s486_s25 = scalar_lea.vmem %s1228_s0, %s1137_s13  ;;  %s492_s28 = scalar_lea.vmem %s1229_s1, %s1137_s13 }
  0x15   : > { %v609_v10 = vld [vmem:[%s516_s15] sm:$0xff]  ;;  %v610_v12 = vmin.f32 %v608_v9, 120.0  ;;  %653 = vadd.xlane.f32.xlu0 %v925_v11 }
  0x16   : > { %v611_v13 = vmin.f32 %v609_v10, 120.0  ;;  %v629_v14 = vld [vmem:[%s522_s18] sm:$0xff]  ;;  %vm593_vm2 = vcmp.lt.f32.partialorder %v592_v8, inf  ;;  %v597_v16 = vand.u32 2147483647, %v591_v7 }
  0x17   : > { %v630_v15 = vld [vmem:[%s528_s21] sm:$0xff]  ;;  %v910_v20 = vsel %vm593_vm2, 1.0, %v1067_v4 }
  0x18   : > { %v631_v17 = vsub.f32 %v629_v14, %v630_v15  ;;  %v632_v18 = vand.u32 2147483647, %v630_v15  ;;  %v612_v21 = vsub.f32 %v610_v12, %v611_v13  ;;  %v613_v22 = vand.u32 2147483647, %v611_v13  ;;  %v559_v25 = vld [vmem:[%s486_s25] sm:$0xff] }
  0x19   : > { %v596_v23 = vmul.f32 %v910_v20, %v905_v19  ;;  %vm598_vm3 = vcmp.ne.f32.partialorder %v597_v16, %v597_v16  ;;  %v560_v26 = vld [vmem:[%s492_s28] sm:$0xff] }
  0x1a   : > { %vm633_vm4 = vcmp.lt.f32.partialorder %v632_v18, inf  ;;  %v637_v24 = vand.u32 2147483647, %v631_v17  ;;  %v599_v27 = vsel %vm598_vm3, 0.0, %v597_v16  ;;  %vm614_vm5 = vcmp.lt.f32.partialorder %v613_v22, inf }
  0x1b   : > { %v618_v28 = vand.u32 2147483647, %v612_v21  ;;  %v920_v29 = vsel %vm633_vm4, 1.0, %v1067_v4  ;;  %v915_v30 = vsel %vm614_vm5, 1.0, %v1067_v4  ;;  %v561_v33 = vsub.f32 %v559_v25, %v560_v26  ;;  %912 = vst [vmem:[%s1150_s23 + $0x10] sm:$0xff] %v599_v27  ;;  %914 = vst [vmem:[%s1150_s23 + $0x18] sm:$0xff] %v596_v23 }
  0x1c   : > { %v636_v31 = vmul.f32 %v920_v29, %v905_v19  ;;  %v617_v32 = vmul.f32 %v915_v30, %v905_v19  ;;  %vm638_vm7 = vcmp.ne.f32.partialorder %v637_v24, %v637_v24  ;;  %v562_v36 = vand.u32 2147483647, %v560_v26 }
  0x1d   : > { %vm619_vm6 = vcmp.ne.f32.partialorder %v618_v28, %v618_v28  ;;  %v639_v35 = vsel %vm638_vm7, 0.0, %v637_v24  ;;  %v567_v37 = vsel %vm556_vm0, %v561_v33, 0.0 }
  0x1e   : > { %v620_v34 = vsel %vm619_vm6, 0.0, %v618_v28  ;;  %924 = vst [vmem:[%s1150_s23 + $0x38] sm:$0xff] %v636_v31  ;;  %568 = vadd.xlane.f32.xlu0 %v567_v37  ;;  %vm563_vm8 = vcmp.lt.f32.partialorder %v562_v36, inf  ;;  %919 = vst [vmem:[%s1150_s23 + $0x28] sm:$0xff] %v617_v32 }
  0x1f   : > { %917 = vst [vmem:[%s1150_s23 + $0x20] sm:$0xff] %v620_v34  ;;  %922 = vst [vmem:[%s1150_s23 + $0x30] sm:$0xff] %v639_v35  ;;  %v906_v38 = vsel %vm563_vm8, 1.0, %v1067_v4 }
  0x20   : > { %v566_v39 = vmul.f32 %v906_v38, %v905_v19 }
  0x22   : > { %572 = vadd.xlane.f32.xlu1 %v566_v39 }
  0xa2   : > { %v654_v40 = vpop.xlane.xlu0 %653 }
  0xa3   : > { %v655_v41 = vsub.f32 3.0, %v654_v40 }
  0xa5   : > { %v656_v42 = vmax.f32 %v655_v41, 0.0  }
  0xa7   : > { %v657_v43 = vrot.slane %v656_v42, 4 }
  0xa9   : > { %v658_v44 = vmax.f32 %v656_v42, %v657_v43 }
  0xab   : > { %v569_v45 = vpop.xlane.xlu0 %568  ;;  %v659_v46 = vrot.slane %v658_v44, 2 }
  0xac   : > { %v570_v47 = vmul.f32 0.03125, %v569_v45 }
  0xad   : > { %v660_v48 = vmax.f32 %v658_v44, %v659_v46 }
  0xae   : > { %v571_v49 = vsub.f32 %v561_v33, %v570_v47 }
  0xaf   : > { %v573_v50 = vpop.xlane.xlu1 %572  ;;  %v661_v51 = vrot.slane %v660_v48, 1 }
  0xb0   : > { %v577_v52 = vand.u32 2147483647, %v571_v49  ;;  %vm574_vm9 = vcmp.ge.f32.partialorder %v573_v50, 31.5 }
  0xb1   : > { %v907_v53 = vsel %vm574_vm9, 1.0, %v1067_v4  ;;  %v662_v54 = vmax.f32 %v660_v48, %v661_v51 }
  0xb2   : > { %vm578_vm11 = vcmp.ne.f32.partialorder %v577_v52, %v577_v52  ;;  %909 = vst.msk [vmem:[%s1150_s23 + $0x8] sm:$0xff] %vm587_vm10, %v907_v53 }
  0xb3   : > { %v579_v55 = vsel %vm578_vm11, 0.0, %v577_v52  ;;  %933 = vpush %v662_v54 }
  0xb4   : > { %v580_v56 = vmul.f32 %v905_v19, %v579_v55 }
  0xb6   : > { %583 = vst [vmem:[%s1150_s23] sm:$0xff] %v580_v56 }
  0xe4   : > { %s934_s13 = spop %933 }
  0xe5   : > { %p664_p5 = scmp.gt.f32.partialorder %s934_s13, 0.0 }
  0xe6   : > { %vm668_vm12 = vcmp.lt.f32.partialorder (%p664_p5), %v1159_v5, 0.0  ;;  %v1063_v58 = vmov (%p664_p5), 0.0  }
  0xe7   : > { %667 = sbr.rel (!%p664_p5) target bundleno = 612 (0x264), region = 64  ;;  %v669_v57 = vsel (%p664_p5), %vm668_vm12, %v1159_v5, -inf  }
  0xee   : > { %805 = sbr.rel (!%p664_p5) target bundleno = 608 (0x260), region = 127  ;;  %v1047_v59 = vmov (%p664_p5), %v656_v42   ;;  %v1051_v60 = vmov (%p664_p5), %v669_v57   ;;  %v1055_v61 = vmov (%p664_p5), 0.0   ;;  %s1208_s29 = smov (%p664_p5), 0  }
  0xf5 LB: >> { %688 = vmax.xlane.f32.xlu0 %v1053_v60  ;;  %v1068_v63 = vmov 0.0   ;;  %s702_s29 = sadd.s32 1, %s1061_s29   ;;  %s1061_s29 = sphi %s1208_s29, %s702_s29   ;;  %v1057_v61 = vphi %v1055_v61, %v1056_v61   ;;  %v1053_v60 = vphi %v1051_v60, %v701_v60   ;;  %v1049_v59 = vphi %v1047_v59, %v703_v59  }
  0xf6   : >> { %p675_p6 = scmp.lt.s32.totalorder %s702_s29, 3 }
 0x182   : >> { %v689_v62 = vpop.xlane.xlu0 %688 }
 0x183   : >> { %vm690_vm13 = vcmp.eq.f32.partialorder %v1053_v60, %v689_v62  ;;  %v697_v2 = vsub.f32 0.0, %v689_v62 }
 0x184   : >> { %v927_v0 = vsel %vm690_vm13, 1.0, %v1068_v63  ;;  %v701_v60 = vsel %vm690_vm13, -inf, %v1053_v60  }
 0x185   : >> { %693 = vadd.xlane.f32.xlu0 %v927_v0 }
 0x212   : >> { %v694_v1 = vpop.xlane.xlu0 %693 }
 0x213   : >> { %v695_v3 = vmin.f32 %v1049_v59, %v694_v1 }
 0x215   : >> { %vm696_vm14 = vcmp.gt.f32.partialorder %v695_v3, 0.0  ;;  %v698_v4 = vmul.f32 %v697_v2, %v695_v3  ;;  %v703_v59 = vsub.f32 %v1049_v59, %v695_v3  }
 0x217   : >> { %v699_v5 = vsel %vm696_vm14, %v698_v4, 0.0  ;;  %v676_v7 = vrot.slane %v703_v59, 4 }
 0x218   : >> { %v700_v6 = vadd.f32 %v1057_v61, %v699_v5  }
 0x219   : >> { %v677_v8 = vmax.f32 %v703_v59, %v676_v7 }
 0x21a   : >> { %v1056_v61 = vmov %v700_v6  }
 0x21b   : >> { %v678_v9 = vrot.slane %v677_v8, 2 }
 0x21d   : >> { %v679_v10 = vmax.f32 %v677_v8, %v678_v9 }
 0x21f   : >> { %v680_v11 = vrot.slane %v679_v10, 1 }
 0x221   : >> { %v681_v12 = vmax.f32 %v679_v10, %v680_v11 }
 0x223   : >> { %935 = vpush %v681_v12 }
 0x254   : >> { %s936_s30 = spop %935 }
 0x255   : >> { %p683_p7 = scmp.gt.f32.partialorder %s936_s30, 0.0 }
 0x257   : >> { %p684_p8 = pnand %p683_p7, %p675_p6 }
 0x258   : > { %v1064_v58 = vmov (%p684_p8), %v700_v6  }
 0x259   : > { %687 = sbr.rel (!%p684_p8) target bundleno = 245 (0xf5), region = 133 }
 0x260 PF: > { %v928_v13 = vld [vmem:[%s1150_s23 + $0x40] sm:$0xff]  ;;  %v1065_v58 = vphi %v1063_v58, %v1064_v58  }
 0x261   : > { %v706_v14 = vadd.f32 %v1065_v58, %v928_v13 }
 0x263   : > { %929 = vst.msk [vmem:[%s1150_s23 + $0x40] sm:$0xff] %vm587_vm10, %v706_v14 }
 0x264 PF: > { %s19_s11 = sadd.s32 1, %s1045_s11   ;;  %s1238_s30 = smov %s1041_s10 }
 0x265   : > { %p16_p9 = scmp.ge.s32.totalorder %s19_s11, 4   ;;  %s1239_s10 = smov %s1241_s12 }
 0x267   :  { %18 = sbr.rel (!%p16_p9) target bundleno = 2 (0x2), region = 144 }

</bundles_post_ra>
